<compile_context>
chip_gen: v6e
topology: v6e:2x2x1
jax: 0.10.0
libtpu: 0.0.40
codegen_flags: <defaults>
</compile_context>

<pallas_src>
import jax
import jax.numpy as jnp
from jax.experimental import pallas as pl
from jax.experimental.pallas import tpu as pltpu


# ----------------------------------------------------------------------------
# Deterministic stand-in for the thermal signal generator
# ----------------------------------------------------------------------------
class ThermalSignalGenerator:
    def __init__(self, num_experts):
        self.num_experts = num_experts

    def get_expert_priorities(self):
        # deterministic priorities (expert i gets a small fixed bias)
        return {str(i): 0.05 * i for i in range(self.num_experts)}


def _round_up(a, b):
    return (a + b - 1) // b * b


# ----------------------------------------------------------------------------
# Generation-aware defaults (token tile, VMEM limit, megacore strategy)
# ----------------------------------------------------------------------------
def _tpu_profile():
    kind = ""
    try:
        kind = jax.devices()[0].device_kind.lower()
    except Exception:
        pass
    vmem_phys = None
    try:
        vmem_phys = int(pltpu.get_tpu_info().vmem_capacity_bytes)
    except Exception:
        pass
    is_v7 = ("v7" in kind) or (vmem_phys is not None and vmem_phys <= 64 * 1024 * 1024)
    is_v5e = ("v5e" in kind) or ("v5 lite" in kind) or ("v5litepod" in kind)
    if is_v7:
        # 64 MiB physical per TC: never request all of it -> leave internal-scratch room.
        return dict(name="v7x", vmem_limit_bytes=52 * 1024 * 1024, tm=512,
                    core_parallel=True)
    if is_v5e:
        # ~240 FLOP/byte weight-streaming roofline -> tm=256 suffices; deep buffering room.
        return dict(name="v5e", vmem_limit_bytes=96 * 1024 * 1024, tm=256,
                    core_parallel=False)
    # v6e / other 128 MiB-class parts.
    return dict(name="v6e", vmem_limit_bytes=96 * 1024 * 1024, tm=512,
                core_parallel=False)


def _choose_tiles(T, D, profile):
    """Pick (tm, tkh): token tile and hidden-dim chunk of the (D, D) expert weights."""
    vmem = profile["vmem_limit_bytes"]
    # --- hidden-dim chunk: W1 (D, tkh) + W2 (tkh, D), bf16, double-buffered ---
    weight_budget = int(vmem * 0.45)
    tkh = D
    if 8 * D * D > weight_budget:
        for c in (2048, 1024, 512, 256, 128):
            if c < D and D % c == 0 and 8 * D * c <= weight_budget:
                tkh = c
                break
        # else: no 128-multiple divisor fits; fall back to tkh = D.
        # TODO(synk): pad D to a multiple of 128 so oddly-shaped huge d_model tiles too.
    # --- token tile: as large as the remaining VMEM allows (weight-streaming roofline) ---
    tm = profile["tm"]
    remaining = vmem - 8 * D * tkh - (4 << 20)
    per_token_bytes = 16 * D            # x (bf16, 2 bufs) + out (f32, 2 bufs) + f32 acc
    cap = remaining // max(1, per_token_bytes)
    if cap >= 128:
        tm = min(tm, (cap // 128) * 128)
    else:
        tm = min(tm, max(8, (cap // 8) * 8))
    if tm >= T:
        tm = _round_up(max(T, 8), 16)                     # single full tile
    else:
        tm = max(128, (tm // 128) * 128) if tm >= 128 else _round_up(tm, 16)
    return int(tm), int(tkh)


# ----------------------------------------------------------------------------
# Pallas wrapper: per-expert MLP (Linear -> ReLU -> Linear) + weighted accumulate
# grid = (token_tile, expert, hidden_chunk); expert & chunk axes reduce into acc.
# ----------------------------------------------------------------------------
def moe_expert_combine(x, w_dense, W1, b1, W2, b2, *, tm=None, tkh=None,
                       out_dtype=jnp.float32):
    """x: (T, D) f32; w_dense: (T, E) dense combine weights (0 for non-routed tokens)."""
    T, D = x.shape
    E = W1.shape[0]
    profile = _tpu_profile()

    auto_tm, auto_tkh = _choose_tiles(T, D, profile)
    tm = auto_tm if tm is None else _round_up(int(tm), 8)
    tkh = auto_tkh if tkh is None else int(tkh)
    if D % tkh != 0 or (tkh != D and tkh % 128 != 0):
        tkh = D                                           # keep blocks layout-legal
    nkh = D // tkh

    T_pad = _round_up(T, tm)
    nt = T_pad // tm

    # Pad tokens; padded rows carry zero combine weight -> contribute nothing.
    x_pad = jnp.pad(x, ((0, T_pad - T), (0, 0)))
    w_pad = jnp.pad(w_dense, ((0, T_pad - T), (0, 0)))

    # Pre-arranged combine weights (E, T_pad, 1): per-expert (tm, 1) slab via BlockSpec,
    # so the kernel does no iota/where/cross-lane work.
    w_e = jnp.transpose(w_pad, (1, 0))[:, :, None].astype(jnp.float32)

    # ---- scalar-prefetch tables (flattened 1D -> minimal SMEM padding) ----
    # mask[t*E+e]: does any token of tile t route to expert e?  (w_dense > 0 is exact:
    #   softmax probs of routed experts are > 0; an exact-0 underflow would have been a
    #   zero contribution anyway -- do NOT change this predicate to a threshold.)
    # eff[t*E+e]: expert whose weights should sit in VMEM at step (t, e): e when active,
    #   otherwise the most recently fetched expert, so the index_map returns an unchanged
    #   block index and Pallas elides the weight DMA for skipped (tile, expert) pairs.
    routed = (w_pad > 0).reshape(nt, tm, E).any(axis=1)
    mask_flat = routed.reshape(-1).astype(jnp.int32)                       # (nt*E,)
    e_ids = jnp.tile(jnp.arange(E, dtype=jnp.int32), nt)
    pos = jnp.arange(nt * E, dtype=jnp.int32)
    last_active = jnp.maximum(
        jax.lax.cummax(jnp.where(mask_flat > 0, pos, -1), axis=0), 0)
    eff_flat = jnp.take(e_ids, last_active)                                # (nt*E,)

    # ---- index maps (scalar-prefetch refs arrive as trailing positional args) ----
    def _chunk(kc, m):
        # active -> real chunk index; skipped -> last chunk of the resident expert
        return kc * m + (nkh - 1) * (1 - m)

    def x_map(t, e, kc, eff, mask):
        return (t, 0)

    def wgt_map(t, e, kc, eff, mask):
        return (e, t, 0)

    def w1_map(t, e, kc, eff, mask):
        i = t * E + e
        return (eff[i], 0, _chunk(kc, mask[i]))

    def b1_map(t, e, kc, eff, mask):
        i = t * E + e
        return (eff[i], 0, _chunk(kc, mask[i]))

    def w2_map(t, e, kc, eff, mask):
        i = t * E + e
        return (eff[i], _chunk(kc, mask[i]), 0)

    def b2_map(t, e, kc, eff, mask):
        return (eff[t * E + e], 0, 0)

    def out_map(t, e, kc, eff, mask):
        return (t, 0)

    # ---- kernel ----
    def kernel(eff_ref, mask_ref, x_ref, w_ref, w1_ref, b1_ref, w2_ref, b2_ref,
               out_ref, acc_ref):
        t = pl.program_id(0)
        e = pl.program_id(1)
        kc = pl.program_id(2)

        @pl.when(jnp.logical_and(e == 0, kc == 0))
        def _():
            acc_ref[...] = jnp.zeros_like(acc_ref)

        # Skip compute when no token of this tile routes to expert e (the corresponding
        # weight DMAs are already elided by the eff/mask-driven index maps above).
        @pl.when(mask_ref[t * E + e] > 0)
        def _():
            x_t = x_ref[...]                                               # (tm, D) bf16
            h = jnp.dot(x_t, w1_ref[0],
                        preferred_element_type=jnp.float32) + b1_ref[0]    # (tm, tkh) f32
            h = jnp.maximum(h, 0.0)                                        # ReLU in f32
            y = jnp.dot(h.astype(jnp.bfloat16), w2_ref[0],
                        preferred_element_type=jnp.float32)                # (tm, D) f32
            # second-layer bias added exactly once per expert (first hidden chunk only)
            y = y + (kc == 0).astype(jnp.float32) * b2_ref[0]
            acc_ref[...] += w_ref[0] * y                                   # (tm,1)*(tm,D)

        @pl.when(jnp.logical_and(e == E - 1, kc == nkh - 1))
        def _():
            out_ref[...] = acc_ref[...].astype(out_ref.dtype)

    grid_spec = pltpu.PrefetchScalarGridSpec(
        num_scalar_prefetch=2,
        grid=(nt, E, nkh),                     # expert + hidden-chunk are the reduction
        in_specs=[
            pl.BlockSpec((tm, D), x_map),           # x tile               (bf16)
            pl.BlockSpec((1, tm, 1), wgt_map),      # combine weights      (f32)
            pl.BlockSpec((1, D, tkh), w1_map),      # W1[e][:, chunk]      (bf16)
            pl.BlockSpec((1, 1, tkh), b1_map),      # b1[e][chunk]         (f32)
            pl.BlockSpec((1, tkh, D), w2_map),      # W2[e][chunk, :]      (bf16)
            pl.BlockSpec((1, 1, D), b2_map),        # b2[e]                (f32)
        ],
        out_specs=pl.BlockSpec((tm, D), out_map),
        scratch_shapes=[pltpu.VMEM((tm, D), jnp.float32)],    # resident f32 accumulator
    )

    # Upper-bound cost hint so XLA schedules the gate/top-k glue around the custom call.
    flops = 4 * T_pad * D * D * E
    bytes_accessed = nt * E * 4 * D * D + T_pad * D * (2 + 4) + E * T_pad * 4
    cost = pl.CostEstimate(flops=flops, transcendentals=0,
                           bytes_accessed=bytes_accessed)

    if profile["core_parallel"]:
        dims = (pltpu.CORE_PARALLEL, pltpu.ARBITRARY, pltpu.ARBITRARY)
    else:
        dims = ("parallel", "arbitrary", "arbitrary")

    out_pad = pl.pallas_call(
        kernel,
        out_shape=jax.ShapeDtypeStruct((T_pad, D), out_dtype),
        grid_spec=grid_spec,
        compiler_params=pltpu.CompilerParams(
            dimension_semantics=dims,
            vmem_limit_bytes=profile["vmem_limit_bytes"],
        ),
        cost_estimate=cost,
    )(
        eff_flat,
        mask_flat,
        x_pad.astype(jnp.bfloat16),
        w_e,
        W1.astype(jnp.bfloat16),
        b1.astype(jnp.float32),
        W2.astype(jnp.bfloat16),
        b2.astype(jnp.float32),
    )
    return out_pad[:T]


# ----------------------------------------------------------------------------
# Full MoETransformerBlock forward
# ----------------------------------------------------------------------------
def moe_transformer_block(x, params, top_k, thermal_bias, *, tm=None, tkh=None):
    """Replicates MoETransformerBlock.forward -> (output, aux_loss, metrics)."""
    T, D = x.shape
    E = params["Wg"].shape[1]

    # --- gate (tiny O(T*D*E), lane-sparse E << 128 -> left to XLA, fuses with glue) ---
    gate_logits = jnp.dot(x, params["Wg"]) + params["bg"]             # (T, E)

    # --- AdaptiveRouter: thermal-biased top-k + softmax over top-k vals ---
    biased_logits = gate_logits + thermal_bias[None, :]
    topk_vals, topk_idx = jax.lax.top_k(biased_logits, top_k)         # (T, K)
    top_k_probs = jax.nn.softmax(topk_vals, axis=-1)                  # (T, K)

    # --- aux loss (same formula as SimpleMoELayer) ---
    gate_probs_all = jax.nn.softmax(gate_logits, axis=-1)             # (T, E)
    top1 = topk_idx[:, 0]
    expert_mask_top1 = jax.nn.one_hot(top1, E, dtype=jnp.float32)     # (T, E)
    tokens_per_expert = expert_mask_top1.sum(axis=0)                  # (E,)
    avg_gate_prob = gate_probs_all.mean(axis=0)                       # (E,)
    aux_loss = jnp.sum(tokens_per_expert / (T + 1e-8) * avg_gate_prob) * E

    # --- dense combine weights: w[t, e] = sum_k probs[t,k] * (idx[t,k] == e) ---
    onehot = jax.nn.one_hot(topk_idx, E, dtype=jnp.float32)           # (T, K, E)
    w_dense = jnp.sum(onehot * top_k_probs[..., None], axis=1)        # (T, E)

    # --- per-expert MLP + weighted combine (Pallas, hot path) ---
    output = moe_expert_combine(
        x, w_dense, params["W1"], params["b1"], params["W2"], params["b2"],
        tm=tm, tkh=tkh,
    )

    # --- metrics ---
    # TODO(synk): per-expert wall-clock timings (time.time) have no device equivalent.
    expert_usage_counts = jnp.sum(
        jnp.any(topk_idx[:, :, None] == jnp.arange(E)[None, None, :], axis=1)
        .astype(jnp.float32),
        axis=0,
    )
    metrics = {
        "expert_usage_current": expert_usage_counts,
        "total_assignments": expert_usage_counts.sum(),
        "top_k_indices": topk_idx,
    }
    return output, aux_loss, metrics


# ----------------------------------------------------------------------------
# Pure-JAX dense reference (correctness check only)
# ----------------------------------------------------------------------------
def moe_transformer_block_reference(x, params, top_k, thermal_bias):
    T, D = x.shape
    E = params["Wg"].shape[1]
    gate_logits = jnp.dot(x, params["Wg"]) + params["bg"]
    biased = gate_logits + thermal_bias[None, :]
    vals, idx = jax.lax.top_k(biased, top_k)
    probs = jax.nn.softmax(vals, axis=-1)
    onehot = jax.nn.one_hot(idx, E, dtype=jnp.float32)
    w_dense = jnp.sum(onehot * probs[..., None], axis=1)
    h = jnp.maximum(jnp.einsum("td,edh->eth", x, params["W1"]) + params["b1"], 0.0)
    y = jnp.einsum("eth,ehd->etd", h, params["W2"]) + params["b2"]
    out = jnp.einsum("etd,te->td", y, w_dense)
    gate_probs_all = jax.nn.softmax(gate_logits, axis=-1)
    top1_mask = jax.nn.one_hot(idx[:, 0], E, dtype=jnp.float32)
    aux = jnp.sum(top1_mask.sum(0) / (T + 1e-8) * gate_probs_all.mean(0)) * E
    return out, aux


# ----------------------------------------------------------------------------
# Deterministic parameter init (PyTorch nn.Linear-style uniform(-1/sqrt(fan_in), ...))
# ----------------------------------------------------------------------------
def init_params(key, d_model, num_experts):
    ks = jax.random.split(key, 6)
    bound = 1.0 / jnp.sqrt(d_model)
    return {
        "Wg": jax.random.uniform(ks[0], (d_model, num_experts), jnp.float32,
                                 -bound, bound),
        "bg": jax.random.uniform(ks[1], (1, num_experts), jnp.float32, -bound, bound),
        "W1": jax.random.uniform(ks[2], (num_experts, d_model, d_model), jnp.float32,
                                 -bound, bound),
        "b1": jax.random.uniform(ks[3], (num_experts, 1, d_model), jnp.float32,
                                 -bound, bound),
        "W2": jax.random.uniform(ks[4], (num_experts, d_model, d_model), jnp.float32,
                                 -bound, bound),
        "b2": jax.random.uniform(ks[5], (num_experts, 1, d_model), jnp.float32,
                                 -bound, bound),
    }


if __name__ == "__main__":
    d_model = 32
    num_experts = 4
    top_k = 2
    num_tokens = 50          # not a multiple of the tile -> exercises the padding path

    key = jax.random.PRNGKey(0)
    k_x, k_p = jax.random.split(key)
    x = jax.random.normal(k_x, (num_tokens, d_model), dtype=jnp.float32)
    params = init_params(k_p, d_model, num_experts)

    tsg = ThermalSignalGenerator(num_experts)
    prios = tsg.get_expert_priorities()
    thermal_bias = jnp.array(
        [prios.get(str(i), 0.0) for i in range(num_experts)], dtype=jnp.float32
    )

    ref_out, ref_aux = moe_transformer_block_reference(x, params, top_k, thermal_bias)

    # 1) explicit small tile -> 4 token tiles x 4 experts: exercises token tiling,
    #    padding, the scalar-prefetch tables and the DMA-eliding block-mask skip.
    out1, aux1, metrics = moe_transformer_block(x, params, top_k, thermal_bias, tm=16)
    # 2) generation-aware auto-tiling path (single full tile at this tiny size).
    out2, aux2, _ = moe_transformer_block(x, params, top_k, thermal_bias)

    jax.block_until_ready(out1)
    jax.block_until_ready(out2)
    jax.block_until_ready(aux1)
    jax.block_until_ready(metrics["expert_usage_current"])

    assert out1.shape == (num_tokens, d_model)
    assert jnp.isfinite(out1).all() and jnp.isfinite(out2).all()
    assert jnp.isfinite(aux1)
    # bf16 MXU inputs vs f32 reference -> loose tolerance
    assert jnp.allclose(out1, ref_out, atol=5e-2, rtol=5e-2), \
        float(jnp.max(jnp.abs(out1 - ref_out)))
    assert jnp.allclose(out2, ref_out, atol=5e-2, rtol=5e-2), \
        float(jnp.max(jnp.abs(out2 - ref_out)))
    assert jnp.allclose(aux1, ref_aux, atol=1e-5, rtol=1e-5)
    print("KERNEL_OK")
</pallas_src>

<mosaic_0001>
module attributes {stable_mosaic.version = 11 : i64} {
  func.func @kernel(%arg0: i32, %arg1: i32, %arg2: i32, %arg3: memref<16xi32, #tpu.memory_space<smem>>, %arg4: memref<16xi32, #tpu.memory_space<smem>>, %arg5: memref<16x32xbf16, #tpu.memory_space<vmem>>, %arg6: memref<1x16x1xf32, #tpu.memory_space<vmem>>, %arg7: memref<1x32x32xbf16, #tpu.memory_space<vmem>>, %arg8: memref<1x1x32xf32, #tpu.memory_space<vmem>>, %arg9: memref<1x32x32xbf16, #tpu.memory_space<vmem>>, %arg10: memref<1x1x32xf32, #tpu.memory_space<vmem>>, %arg11: memref<16x32xf32, #tpu.memory_space<vmem>>, %arg12: memref<16x32xf32, #tpu.memory_space<vmem>>) attributes {dimension_semantics = [#tpu.dimension_semantics<parallel>, #tpu.dimension_semantics<arbitrary>, #tpu.dimension_semantics<arbitrary>], iteration_bounds = array<i64: 4, 4, 1>, scalar_prefetch = 2 : i64, scratch_operands = 1 : i64, tpu.core_type = #tpu.core_type<tc>, window_params = [{transform_indices = @transform_0, window_bounds = array<i64: 16, 32>}, {transform_indices = @transform_1, window_bounds = array<i64: 1, 16, 1>}, {transform_indices = @transform_2, window_bounds = array<i64: 1, 32, 32>}, {transform_indices = @transform_3, window_bounds = array<i64: 1, 1, 32>}, {transform_indices = @transform_4, window_bounds = array<i64: 1, 32, 32>}, {transform_indices = @transform_5, window_bounds = array<i64: 1, 1, 32>}, {transform_indices = @transform_6, window_bounds = array<i64: 16, 32>}]} {
    %c0_i32 = arith.constant 0 : i32
    %0 = arith.cmpi eq, %arg1, %c0_i32 : i32
    %c0_i32_0 = arith.constant 0 : i32
    %1 = arith.cmpi eq, %arg2, %c0_i32_0 : i32
    %2 = arith.andi %0, %1 : i1
    %3 = arith.extui %2 : i1 to i32
    %c0_i32_1 = arith.constant 0 : i32
    %4 = arith.cmpi ne, %3, %c0_i32_1 : i32
    scf.if %4 {
      %cst = arith.constant 0.000000e+00 : f32
      %17 = vector.broadcast %cst : f32 to vector<16x32xf32>
      %c0 = arith.constant 0 : index
      %c0_6 = arith.constant 0 : index
      %18 = vector.load %arg12[%c0, %c0_6] : memref<16x32xf32, #tpu.memory_space<vmem>>, vector<16x32xf32>
      tpu.vector_store %arg12[%c0, %c0_6], %17 {strides = array<i32>} : memref<16x32xf32, #tpu.memory_space<vmem>>, vector<16x32xf32>,
    } else {
    }
    %c4_i32 = arith.constant 4 : i32
    %5 = arith.muli %arg0, %c4_i32 : i32
    %6 = arith.addi %5, %arg1 : i32
    %7 = arith.index_cast %6 : i32 to index
    %8 = memref.load %arg4[%7] : memref<16xi32, #tpu.memory_space<smem>>
    %c0_i32_2 = arith.constant 0 : i32
    %9 = arith.cmpi sgt, %8, %c0_i32_2 : i32
    %10 = arith.extui %9 : i1 to i32
    %c0_i32_3 = arith.constant 0 : i32
    %11 = arith.cmpi ne, %10, %c0_i32_3 : i32
    scf.if %11 {
      %c0 = arith.constant 0 : index
      %c0_6 = arith.constant 0 : index
      %17 = vector.load %arg5[%c0, %c0_6] : memref<16x32xbf16, #tpu.memory_space<vmem>>, vector<16x32xbf16>
      %c0_7 = arith.constant 0 : index
      %c0_8 = arith.constant 0 : index
      %c0_9 = arith.constant 0 : index
      %18 = vector.load %arg7[%c0_7, %c0_8, %c0_9] : memref<1x32x32xbf16, #tpu.memory_space<vmem>>, vector<1x32x32xbf16>
      %19 = vector.shape_cast %18 : vector<1x32x32xbf16> to vector<32x32xbf16>
      %cst = arith.constant dense<0.000000e+00> : vector<16x32xf32>
      %20 = tpu.matmul %17, %19, %cst {dimension_numbers = #tpu.dot_dimension_numbers<[1], [0], [0], [1], [0, 0, 1, 1], [], []>} : vector<16x32xbf16>, vector<32x32xbf16>, vector<16x32xf32> -> vector<16x32xf32>
      %c0_10 = arith.constant 0 : index
      %c0_11 = arith.constant 0 : index
      %c0_12 = arith.constant 0 : index
      %21 = vector.load %arg8[%c0_10, %c0_11, %c0_12] : memref<1x1x32xf32, #tpu.memory_space<vmem>>, vector<1x1x32xf32>
      %22 = vector.shape_cast %21 : vector<1x1x32xf32> to vector<1x32xf32>
      %23 = vector.broadcast %22 : vector<1x32xf32> to vector<16x32xf32>
      %24 = arith.addf %20, %23 : vector<16x32xf32>
      %cst_13 = arith.constant 0.000000e+00 : f32
      %25 = vector.broadcast %cst_13 : f32 to vector<16x32xf32>
      %26 = arith.maximumf %24, %25 : vector<16x32xf32>
      %27 = arith.truncf %26 : vector<16x32xf32> to vector<16x32xbf16>
      %c0_14 = arith.constant 0 : index
      %c0_15 = arith.constant 0 : index
      %c0_16 = arith.constant 0 : index
      %28 = vector.load %arg9[%c0_14, %c0_15, %c0_16] : memref<1x32x32xbf16, #tpu.memory_space<vmem>>, vector<1x32x32xbf16>
      %29 = vector.shape_cast %28 : vector<1x32x32xbf16> to vector<32x32xbf16>
      %cst_17 = arith.constant dense<0.000000e+00> : vector<16x32xf32>
      %30 = tpu.matmul %27, %29, %cst_17 {dimension_numbers = #tpu.dot_dimension_numbers<[1], [0], [0], [1], [0, 0, 1, 1], [], []>} : vector<16x32xbf16>, vector<32x32xbf16>, vector<16x32xf32> -> vector<16x32xf32>
      %c0_i32_18 = arith.constant 0 : i32
      %31 = arith.cmpi eq, %arg2, %c0_i32_18 : i32
      %32 = arith.extui %31 : i1 to i32
      %33 = arith.sitofp %32 : i32 to f32
      %c0_19 = arith.constant 0 : index
      %c0_20 = arith.constant 0 : index
      %c0_21 = arith.constant 0 : index
      %34 = vector.load %arg10[%c0_19, %c0_20, %c0_21] : memref<1x1x32xf32, #tpu.memory_space<vmem>>, vector<1x1x32xf32>
      %35 = vector.shape_cast %34 : vector<1x1x32xf32> to vector<1x32xf32>
      %36 = vector.broadcast %33 : f32 to vector<1x32xf32>
      %37 = arith.mulf %36, %35 : vector<1x32xf32>
      %38 = vector.broadcast %37 : vector<1x32xf32> to vector<16x32xf32>
      %39 = arith.addf %30, %38 : vector<16x32xf32>
      %c0_22 = arith.constant 0 : index
      %c0_23 = arith.constant 0 : index
      %40 = vector.load %arg12[%c0_22, %c0_23] : memref<16x32xf32, #tpu.memory_space<vmem>>, vector<16x32xf32>
      %c0_24 = arith.constant 0 : index
      %c0_25 = arith.constant 0 : index
      %c0_26 = arith.constant 0 : index
      %41 = vector.load %arg6[%c0_24, %c0_25, %c0_26] : memref<1x16x1xf32, #tpu.memory_space<vmem>>, vector<1x16x1xf32>
      %42 = vector.shape_cast %41 : vector<1x16x1xf32> to vector<16x1xf32>
      %43 = vector.broadcast %42 : vector<16x1xf32> to vector<16x32xf32>
      %44 = arith.mulf %43, %39 : vector<16x32xf32>
      %45 = arith.addf %40, %44 : vector<16x32xf32>
      %c0_27 = arith.constant 0 : index
      %c0_28 = arith.constant 0 : index
      %46 = vector.load %arg12[%c0_27, %c0_28] : memref<16x32xf32, #tpu.memory_space<vmem>>, vector<16x32xf32>
      tpu.vector_store %arg12[%c0_27, %c0_28], %45 {strides = array<i32>} : memref<16x32xf32, #tpu.memory_space<vmem>>, vector<16x32xf32>,
    } else {
    }
    %c3_i32 = arith.constant 3 : i32
    %12 = arith.cmpi eq, %arg1, %c3_i32 : i32
    %c0_i32_4 = arith.constant 0 : i32
    %13 = arith.cmpi eq, %arg2, %c0_i32_4 : i32
    %14 = arith.andi %12, %13 : i1
    %15 = arith.extui %14 : i1 to i32
    %c0_i32_5 = arith.constant 0 : i32
    %16 = arith.cmpi ne, %15, %c0_i32_5 : i32
    scf.if %16 {
      %c0 = arith.constant 0 : index
      %c0_6 = arith.constant 0 : index
      %17 = vector.load %arg12[%c0, %c0_6] : memref<16x32xf32, #tpu.memory_space<vmem>>, vector<16x32xf32>
      %c0_7 = arith.constant 0 : index
      %c0_8 = arith.constant 0 : index
      %18 = vector.load %arg11[%c0_7, %c0_8] : memref<16x32xf32, #tpu.memory_space<vmem>>, vector<16x32xf32>
      tpu.vector_store %arg11[%c0_7, %c0_8], %17 {strides = array<i32>} : memref<16x32xf32, #tpu.memory_space<vmem>>, vector<16x32xf32>,
    } else {
    }
    return
  }
  func.func @transform_0(%arg0: i32, %arg1: i32, %arg2: i32, %arg3: memref<16xi32, #tpu.memory_space<smem>>, %arg4: memref<16xi32, #tpu.memory_space<smem>>) -> (i32, i32) {
    %c0_i32 = arith.constant 0 : i32
    %c0_i32_0 = arith.constant 0 : i32
    return %arg0, %c0_i32 : i32, i32
  }
  func.func @transform_1(%arg0: i32, %arg1: i32, %arg2: i32, %arg3: memref<16xi32, #tpu.memory_space<smem>>, %arg4: memref<16xi32, #tpu.memory_space<smem>>) -> (i32, i32, i32) {
    %c0_i32 = arith.constant 0 : i32
    %c0_i32_0 = arith.constant 0 : i32
    return %arg1, %arg0, %c0_i32 : i32, i32, i32
  }
  func.func @transform_2(%arg0: i32, %arg1: i32, %arg2: i32, %arg3: memref<16xi32, #tpu.memory_space<smem>>, %arg4: memref<16xi32, #tpu.memory_space<smem>>) -> (i32, i32, i32) {
    %c4_i32 = arith.constant 4 : i32
    %0 = arith.muli %arg0, %c4_i32 : i32
    %1 = arith.addi %0, %arg1 : i32
    %2 = arith.index_cast %1 : i32 to index
    %3 = memref.load %arg3[%2] : memref<16xi32, #tpu.memory_space<smem>>
    %4 = arith.index_cast %1 : i32 to index
    %5 = memref.load %arg4[%4] : memref<16xi32, #tpu.memory_space<smem>>
    %6 = arith.muli %arg2, %5 : i32
    %c1_i32 = arith.constant 1 : i32
    %7 = arith.subi %c1_i32, %5 : i32
    %c0_i32 = arith.constant 0 : i32
    %8 = arith.muli %c0_i32, %7 : i32
    %9 = arith.addi %6, %8 : i32
    %c0_i32_0 = arith.constant 0 : i32
    %c0_i32_1 = arith.constant 0 : i32
    return %3, %c0_i32_0, %9 : i32, i32, i32
  }
  func.func @transform_3(%arg0: i32, %arg1: i32, %arg2: i32, %arg3: memref<16xi32, #tpu.memory_space<smem>>, %arg4: memref<16xi32, #tpu.memory_space<smem>>) -> (i32, i32, i32) {
    %c4_i32 = arith.constant 4 : i32
    %0 = arith.muli %arg0, %c4_i32 : i32
    %1 = arith.addi %0, %arg1 : i32
    %2 = arith.index_cast %1 : i32 to index
    %3 = memref.load %arg3[%2] : memref<16xi32, #tpu.memory_space<smem>>
    %4 = arith.index_cast %1 : i32 to index
    %5 = memref.load %arg4[%4] : memref<16xi32, #tpu.memory_space<smem>>
    %6 = arith.muli %arg2, %5 : i32
    %c1_i32 = arith.constant 1 : i32
    %7 = arith.subi %c1_i32, %5 : i32
    %c0_i32 = arith.constant 0 : i32
    %8 = arith.muli %c0_i32, %7 : i32
    %9 = arith.addi %6, %8 : i32
    %c0_i32_0 = arith.constant 0 : i32
    %c0_i32_1 = arith.constant 0 : i32
    return %3, %c0_i32_0, %9 : i32, i32, i32
  }
  func.func @transform_4(%arg0: i32, %arg1: i32, %arg2: i32, %arg3: memref<16xi32, #tpu.memory_space<smem>>, %arg4: memref<16xi32, #tpu.memory_space<smem>>) -> (i32, i32, i32) {
    %c4_i32 = arith.constant 4 : i32
    %0 = arith.muli %arg0, %c4_i32 : i32
    %1 = arith.addi %0, %arg1 : i32
    %2 = arith.index_cast %1 : i32 to index
    %3 = memref.load %arg3[%2] : memref<16xi32, #tpu.memory_space<smem>>
    %4 = arith.index_cast %1 : i32 to index
    %5 = memref.load %arg4[%4] : memref<16xi32, #tpu.memory_space<smem>>
    %6 = arith.muli %arg2, %5 : i32
    %c1_i32 = arith.constant 1 : i32
    %7 = arith.subi %c1_i32, %5 : i32
    %c0_i32 = arith.constant 0 : i32
    %8 = arith.muli %c0_i32, %7 : i32
    %9 = arith.addi %6, %8 : i32
    %c0_i32_0 = arith.constant 0 : i32
    %c0_i32_1 = arith.constant 0 : i32
    return %3, %9, %c0_i32_0 : i32, i32, i32
  }
  func.func @transform_5(%arg0: i32, %arg1: i32, %arg2: i32, %arg3: memref<16xi32, #tpu.memory_space<smem>>, %arg4: memref<16xi32, #tpu.memory_space<smem>>) -> (i32, i32, i32) {
    %c4_i32 = arith.constant 4 : i32
    %0 = arith.muli %arg0, %c4_i32 : i32
    %1 = arith.addi %0, %arg1 : i32
    %2 = arith.index_cast %1 : i32 to index
    %3 = memref.load %arg3[%2] : memref<16xi32, #tpu.memory_space<smem>>
    %c0_i32 = arith.constant 0 : i32
    %c0_i32_0 = arith.constant 0 : i32
    %c0_i32_1 = arith.constant 0 : i32
    return %3, %c0_i32, %c0_i32_0 : i32, i32, i32
  }
  func.func @transform_6(%arg0: i32, %arg1: i32, %arg2: i32, %arg3: memref<16xi32, #tpu.memory_space<smem>>, %arg4: memref<16xi32, #tpu.memory_space<smem>>) -> (i32, i32) {
    %c0_i32 = arith.constant 0 : i32
    %c0_i32_0 = arith.constant 0 : i32
    return %arg0, %c0_i32 : i32, i32
  }
}

</mosaic_0001>

<bundles_post_ra>
// kernel: tpu_custom_call.1
= control target key start
LH: loop header
LB: loop body
LE: loop exit
PB: predicated region body
PF: predicated region fallthrough
CT: control target
= control target key end

     0   :  { %s1253_s0 = inlined_call_operand.vmem [shape: s32[16], index: 0, kind: input, shape index: {}]   ;;  %s1254_s2 = inlined_call_operand.vmem [shape: bf16[64,32], index: 2, kind: input, shape index: {}]   ;;  %s1255_s3 = inlined_call_operand.vmem [shape: f32[4,64,1], index: 3, kind: input, shape index: {}]   ;;  %s1256_s4 = inlined_call_operand.vmem [shape: bf16[4,32,32], index: 4, kind: input, shape index: {}]   ;;  %s1257_s5 = inlined_call_operand.vmem [shape: f32[4,1,32], index: 5, kind: input, shape index: {}]   ;;  %s1258_s6 = inlined_call_operand.vmem [shape: bf16[4,32,32], index: 6, kind: input, shape index: {}]   ;;  %s1259_s7 = inlined_call_operand.vmem [shape: f32[4,1,32], index: 7, kind: input, shape index: {}]   ;;  %s1260_s8 = inlined_call_operand.vmem [shape: f32[64,32], index: 8, kind: output, shape index: {}]   ;;  %s1261_s1 = inlined_call_operand.vmem [shape: s32[16], index: 1, kind: input, shape index: {}]  }
   0x1   :  { %1262 = sst [smem:[#allocation8_spill]] %s1254_s2  ;;  %s13_s29 = sshll.u32 %s1253_s0, 4  ;;  %s14_s29 = int_to_ptr.vmem [resolvable:$true] %s13_s29 }
   0x2   :  { %1263 = sst [smem:[#allocation9_spill]] %s1255_s3  ;;  %s17_s10 = sshll.u32 %s1261_s1, 4  ;;  %s18_s10 = int_to_ptr.vmem [resolvable:$true] %s17_s10 }
   0x3   :  { %s1017_s11 = scalar_lea.vmem %s14_s29, 16  ;;  %p1022_p1 = scmp.lt.s32.totalorder %s14_s29, %s14_s29 }
   0x4   :  { %p1018_p0 = scmp.ne.s32.totalorder %s14_s29, %s1017_s11  ;;  %p1023_p2 = scmp.lt.s32.totalorder %s1017_s11, %s1017_s11 }
   0x6   :  { %p1024_p3 = por %p1023_p2, %p1022_p1 }
   0x8   :  { %p1025_p4 = pnand %p1024_p3, %p1018_p0 }
   0xa   :  { %1028 = shalt.err (!%p1025_p4)  }
   0xb   :  { %s1083_s12 = smov [#allocation4]   ;;  %s1029_s13 = scalar_lea.vmem %s18_s10, 16 }
   0xc   :  { %16 = dma.vmem_to_smem %s14_s29, 16, %s1083_s12, [#allocation3] }
   0xd   :  { %p1030_p5 = scmp.ne.s32.totalorder %s18_s10, %s1029_s13  ;;  %p1034_p6 = scmp.lt.s32.totalorder %s18_s10, %s18_s10 }
   0xe   :  { %p1035_p7 = scmp.lt.s32.totalorder %s1029_s13, %s1029_s13 }
  0x10   :  { %p1036_p8 = por %p1035_p7, %p1034_p6 }
  0x12   :  { %p1037_p9 = pnand %p1036_p8, %p1030_p5 }
  0x14   :  { %1040 = shalt.err (!%p1037_p9)  }
  0x15   :  { %s1084_s0 = smov [#allocation5]  }
  0x16   :  { %20 = dma.vmem_to_smem %s18_s10, 16, %s1084_s0, [#allocation3] }
  0x17   :  { %1061 = dma.done.wait [#allocation3], 32 }
  0x18   :  { %1062 = vsyncadd [#allocation3], 4294967264 }
  0x19   :  { %22 = sfence }
  0x1a   :  { %s1140_s1 = smov 0   ;;  %s1142_s14 = smov 0  }
  0x1b   :  { %s1144_s15 = smov 0   ;;  %s1146_s16 = smov 0  }
  0x1c   :  { %s1148_s17 = smov 0  }
  0x1d LB: > { %s43_s18 = sadd.s32 1, %s1073_s15  ;;  %s47_s19 = sadd.s32 1, %s1077_s16  ;;  %s1081_s17 = sphi %s1148_s17, %s28_s17   ;;  %s1077_s16 = sphi %s1146_s16, %s1271_s16   ;;  %s1073_s15 = sphi %s1144_s15, %s1270_s15   ;;  %s1069_s14 = sphi %s1142_s14, %s1269_s14   ;;  %s1065_s1 = sphi %s1140_s1, %s1268_s1  }
  0x1e   : > { %p45_p10 = scmp.ge.s32.totalorder %s43_s18, 4  ;;  %p908_p11 = scmp.ge.s32.totalorder %s1081_s17, 1 }
  0x1f   : > { %p386_p12 = scmp.lt.s32.totalorder %s1081_s17, 17 }
  0x20   : > { %s1273_s18 = smov (%p45_p10, %s43_s18), 0  ;;  %s1275_s19 = smov (!%p45_p10, %s47_s19), %s1077_s16 }
  0x21   : > { %p387_p13 = pnand %p908_p11, %p386_p12  ;;  %p49_p0 = scmp.ge.s32.totalorder %s1275_s19, 4 }
  0x22   : > { %s909_s20 = sshll.u32 (!%p387_p13), %s1069_s14, 1  ;;  %p476_p1 = scmp.lt.s32.totalorder (!%p387_p13), %s1065_s1, 3 }
  0x23   : > { %s1277_s19 = smov (%p49_p0, %s1275_s19), 0  ;;  %390 = sbr.rel (%p387_p13) target bundleno = 494 (0x1ee), region = 44 }
  0x24   : > { %1264 = sst [smem:[#allocation7_spill]] %s1277_s19  ;;  %p470_p2 = scmp.lt.s32.totalorder (!%p387_p13), %s909_s20, 7 }
  0x25   : > { %s914_s21 = sshll.u32 (!%p387_p13), %s1069_s14, 2  ;;  %s1265_s2 = sld [smem:[#allocation8_spill]] (!%p387_p13) }
  0x26   : > { %s1175_s24 = sadd.s32 (!%p387_p13), %s1065_s1, %s914_s21  ;;  %s1266_s3 = sld [smem:[#allocation9_spill]] (!%p387_p13) }
  0x27   : > { %s487_s12 = sld [smem:[#allocation4 + %s1175_s24]] (!%p387_p13)  ;;  %p555_p3 = scmp.eq.s32.totalorder (!%p387_p13), %s1065_s1, 0 }
  0x28   : > { %s477_s22 = scalar_select %p476_p1, %s1065_s1, 3  ;;  %vm561_vm0 = vcmask (%p555_p3), 261120   ;;  %v1085_v0 = vmov (%p555_p3), 0.0  }
  0x29   : > { %s1279_s20 = smov (!%p470_p2, %s909_s20), 7  ;;  %s505_s13 = sld [smem:[#allocation4 + %s1175_s24]]  ;;  %562 = vst.msk [vmem:[#allocation2] sm:$0xff] (%p555_p3), %vm561_vm0, %v1085_v0  ;;  %563 = vst.msk [vmem:[#allocation2 + $0x8] sm:$0xff] (%p555_p3), %vm561_vm0, %v1085_v0 }
  0x2a   : > { %s912_s23 = sshll.u32 %s477_s22, 3  ;;  %s910_s25 = sshll.u32 %s1279_s20, 2 }
  0x2b   : > { %s481_s26 = sadd.s32 %s912_s23, %s1279_s20  ;;  %s1180_s29 = scalar_lea.vmem %s1265_s2, %s910_s25 }
  0x2c   : > { %s913_s30 = sshll.u32 %s481_s26, 3  ;;  %s923_s0 = sshll.u32 %s1279_s20, 3 }
  0x2d   : > { %s1185_s11 = scalar_lea.vmem %s1266_s3, %s913_s30  ;;  %s521_s14 = sld [smem:[#allocation4 + %s1175_s24]] }
  0x2e   : > { %s1193_s19 = scalar_lea.vmem %s1260_s8, %s923_s0  ;;  %s541_s23 = sld [smem:[#allocation4 + %s1175_s24]] }
  0x2f   : > { %p490_p4 = scmp.lt.s32.totalorder %s487_s12, 3  ;;  %p508_p5 = scmp.lt.s32.totalorder %s505_s13, 3 }
  0x31   : > { %s1281_s12 = smov (!%p490_p4, %s487_s12), 3  ;;  %s1283_s13 = smov (!%p508_p5, %s505_s13), 3 }
  0x32   : > { %s939_s25 = sshll.u32 %s1281_s12, 4  ;;  %s513_s9 = scalar_lea.vmem %s1257_s5, %s1283_s13 }
  0x33   : > { %p525_p6 = scmp.lt.s32.totalorder %s521_s14, 3  ;;  %s497_s20 = scalar_lea.vmem %s1256_s4, %s939_s25 }
  0x34   : > { %p542_p7 = scmp.lt.s32.totalorder %s541_s23, 3  ;;  %560 = sbr.rel (!%p555_p3) target bundleno = 57 (0x39), region = 48 }
  0x35   : > { %s1285_s14 = smov (!%p525_p6, %s521_s14), 3 }
  0x36   : > { %s940_s10 = sshll.u32 %s1285_s14, 4  ;;  %s1287_s23 = smov (!%p542_p7, %s541_s23), 3 }
  0x37   : > { %s532_s22 = scalar_lea.vmem %s1258_s6, %s940_s10  ;;  %s544_s3 = scalar_lea.vmem %s1259_s7, %s1287_s23 }
  0x39 PF: > { %s566_s14 = sld [smem:[#allocation5 + %s1175_s24]] }
  0x3f   : > { %p926_p8 = scmp.le.s32.totalorder %s566_s14, 0 }
  0x41   : > { %570 = sbr.rel (%p926_p8) target bundleno = 486 (0x1e6), region = 52 }
  0x46   : > { %v1012_v1 = vld [vmem:[%s497_s20 + $0x8] sm:$0xff]   ;;  %v1086_v2 = vmov 0.0   ;;  %v1013_v3 = vld [vmem:[%s497_s20] sm:$0xff]   ;;  %vm1087_vm1 = vmmov 0   ;;  %vm601_vm2 = vcmask 261120   ;;  %v1088_v8 = vmov 0  }
  0x47   : > { %949 = vmatprep.subr.bf16.mxu0 %v1086_v2  ;;  %957 = vmatprep.subr.bf16.mxu1 %v1086_v2  ;;  %v1014_v4 = vld [vmem:[%s1180_s29] sm:$0xff]   ;;  %v1015_v5 = vld [vmem:[%s532_s22 + $0x8] sm:$0xff]  }
  0x48   : > { %950 = vmatpush3.bf16.msra.mxu0 %v1012_v1  ;;  %953 = vmatprep.mubr.msk.bf16.mxu0 %vm1087_vm1, %v1086_v2  ;;  %v1016_v6 = vld [vmem:[%s532_s22] sm:$0xff]   ;;  %v723_v9 = vld [vmem:[%s1185_s11 + $0x8] sm:$0xff] }
  0x49   : > { %951 = vmatprep.subr.bf16.mxu0 %v1086_v2  ;;  %961 = vmatprep.mubr.msk.bf16.mxu1 %vm1087_vm1, %v1086_v2  ;;  %v722_v7 = vld [vmem:[%s1185_s11] sm:$0xff]  ;;  %v721_v31 = vld [vmem:[#allocation2 + $0x8] sm:$0xff] }
  0x4a   : > { %958 = vmatpush3.bf16.msra.mxu1 %v1015_v5  ;;  %1011 = vset.pattern.permute.xlu0 %v1088_v8  ;;  %v927_v10 = vld [vmem:[%s513_s9] ss:$0 sm:$0xff] }
  0x4b   : > { %959 = vmatprep.subr.bf16.mxu1 %v1086_v2  ;;  %726 = vperm.xlu0 %1011, %v722_v7   ;;  %v932_v20 = vld [vmem:[%s544_s3] ss:$0 sm:$0xff] }
  0x4c   : > { %952 = vmatpush3.bf16.msra.mxu0 %v1013_v3  ;;  %v720_v24 = vld [vmem:[#allocation2] sm:$0xff] }
  0x4e   : > { %960 = vmatpush3.bf16.msra.mxu1 %v1016_v6 }
  0x4f   : > { %954 = vmatmul.mubr.msk.bf16.vlgmr.msra.gmra.mxu0 %vm601_vm2, %v1014_v4  ;;  %731 = vperm.xlu0 %1011, %v723_v9  }
  0xc6   : > { %v727_v21 = vpop.permute.xlu0 %726 }
  0xca   : > { %v732_v30 = vpop.permute.xlu0 %731 }
 0x10f   : > { %v639_v11 = vpop.f32.mrf.mxu0 }
 0x110   : > { %v640_v13 = vadd.f32 %v927_v10, %v639_v11 }
 0x111   : > { %v955_v12 = vpop.f32.mrf.mxu0 }
 0x112   : > { %v646_v17 = vmax.f32 %v640_v13, 0.0 }
 0x113   : > { %v642_v14 = vpop.f32.mrf.mxu0 }
 0x114   : > { %v643_v15 = vadd.f32 %v927_v10, %v642_v14 }
 0x115   : > { %v956_v16 = vpop.f32.mrf.mxu0 }
 0x116   : > { %v647_v18 = vmax.f32 %v643_v15, 0.0 }
 0x118   : > { %v648_v19 = vpack.c.bf16 %v647_v18, %v646_v17 }
 0x11a   : > { %962 = vmatmul.mubr.msk.bf16.vlgmr.msra.gmra.mxu1 %vm601_vm2, %v648_v19 }
 0x1da   : > { %v713_v22 = vpop.f32.mrf.mxu1 }
 0x1db   : > { %v714_v23 = vadd.f32 %v932_v20, %v713_v22 }
 0x1dc   : > { %v963_v25 = vpop.f32.mrf.mxu1 }
 0x1dd   : > { %v734_v26 = vmul.f32 %v727_v21, %v714_v23 }
 0x1de   : > { %v716_v27 = vpop.f32.mrf.mxu1 }
 0x1df   : > { %v736_v28 = vadd.f32 %v734_v26, %v720_v24  ;;  %v717_v29 = vadd.f32 %v932_v20, %v716_v27 }
 0x1e0   : > { %v964_v32 = vpop.f32.mrf.mxu1 }
 0x1e1   : > { %738 = vst.msk [vmem:[#allocation2] sm:$0xff] %vm601_vm2, %v736_v28  ;;  %v735_v33 = vmul.f32 %v732_v30, %v717_v29 }
 0x1e3   : > { %v737_v34 = vadd.f32 %v735_v33, %v721_v31 }
 0x1e5   : > { %739 = vst.msk [vmem:[#allocation2 + $0x8] sm:$0xff] %vm601_vm2, %v737_v34 }
 0x1e6 PF: > { %p740_p9 = scmp.eq.s32.totalorder %s1065_s1, 3 }
 0x1e7   : > { %vm747_vm3 = vcmask (%p740_p9), 261120  }
 0x1e8   : > { %744 = sbr.rel (!%p740_p9) target bundleno = 494 (0x1ee), region = 56  ;;  %v745_v35 = vld [vmem:[#allocation2] sm:$0xff] (%p740_p9) }
 0x1e9   : > { %748 = vst.msk [vmem:[%s1193_s19] sm:$0xff] (%p740_p9), %vm747_vm3, %v745_v35 }
 0x1ec   : > { %v746_v36 = vld [vmem:[#allocation2 + $0x8] sm:$0xff] (%p740_p9) }
 0x1ed   : > { %749 = vst.msk [vmem:[%s1193_s19 + $0x8] sm:$0xff] %vm747_vm3, %v746_v36 }
 0x1ee PF: > { %s28_s17 = sadd.s32 1, %s1081_s17   ;;  %s1267_s3 = sld [smem:[#allocation7_spill]] }
 0x1ef   : > { %p25_p10 = scmp.ge.s32.totalorder %s28_s17, 18   ;;  %s1268_s1 = smov %s1073_s15 }
 0x1f0   : > { %s1269_s14 = smov %s1077_s16  ;;  %s1270_s15 = smov %s1273_s18 }
 0x1f1   :  { %27 = sbr.rel (!%p25_p10) target bundleno = 29 (0x1d), region = 101 }
 0x1f4   : > { %s1271_s16 = smov %s1267_s3 }

</bundles_post_ra>
